<compile_context>
chip_gen: v5e
topology: v5e:2x2
jax: 0.10.0
libtpu: 0.0.40
codegen_flags: <defaults>
</compile_context>

<pallas_src>
import math
from functools import partial

import jax
import jax.numpy as jnp
from jax import lax
from jax.experimental import pallas as pl
from jax.experimental.pallas import tpu as pltpu


_GOLDEN = 0x9E3779B9          # 2^32 / golden ratio
_MAX_ROW_TILE = 4096          # 4096 x 128 f32 rows per block = 2 MiB per buffer


def _mix32(x):
    """splitmix32-style finalizer; plenty of diffusion for a dropout mask."""
    x = x ^ (x >> 16)
    x = x * jnp.uint32(0x7FEB352D)
    x = x ^ (x >> 15)
    x = x * jnp.uint32(0x846CA68B)
    x = x ^ (x >> 16)
    return x


def _pe_add_dropout_kernel(seed_ref, x_ref, pe_ref, o_ref, *, p, train):
    """y = dropout(x + pe) on one lane-dense (1, TR, C) tile."""
    y = x_ref[...].astype(jnp.float32) + pe_ref[...].astype(jnp.float32)

    if train and p > 0.0:
        # Keyed-hash PRNG: portable (no pltpu.prng_*), one compare + one select
        # per element in the hot path (integer threshold, no float uniform).
        b = pl.program_id(0)
        t = pl.program_id(1)
        gid = b * pl.num_programs(1) + t                        # unique per tile
        key = _mix32(seed_ref[0].astype(jnp.uint32)
                     + gid.astype(jnp.uint32) * jnp.uint32(_GOLDEN))
        rows = lax.broadcasted_iota(jnp.int32, y.shape, 1)
        cols = lax.broadcasted_iota(jnp.int32, y.shape, 2)
        lin = (rows * y.shape[2] + cols).astype(jnp.uint32)      # unique per elem
        bits = _mix32(lin ^ key)
        threshold = jnp.uint32(min(int(p * 2.0 ** 32), 2 ** 32 - 1))
        keep = bits >= threshold                                 # P(keep) = 1 - p
        y = jnp.where(keep, y * jnp.float32(1.0 / (1.0 - p)), jnp.float32(0.0))

    o_ref[...] = y.astype(o_ref.dtype)


def make_pe_buffer(d_model: int, seq_length: int) -> jax.Array:
    """Faithful replication of the module's __init__ buffer construction."""
    pe = jnp.zeros((seq_length, d_model), jnp.float32)
    position = jnp.arange(seq_length, dtype=jnp.float32)[:, None]
    div_term = jnp.exp(
        jnp.arange(0, d_model, 2, dtype=jnp.float32) * (-math.log(10000.0) / d_model)
    )
    # pe[:, 0::1] = sin(position * div_term)   (broadcasts only for d_model == 2)
    pe = pe.at[:, 0::1].set(jnp.sin(position * div_term))
    # pe[:, 1::2] = cos(position * div_term)
    pe = pe.at[:, 1::2].set(jnp.cos(position * div_term))
    return pe[None]   # (1, seq_length, d_model) — the registered buffer `self.pe`


def _choose_row_tile(num_rows: int) -> int:
    """Largest row tile <= _MAX_ROW_TILE dividing num_rows (prefer multiple of 8)."""
    if num_rows <= _MAX_ROW_TILE:
        return num_rows
    for tr in range(_MAX_ROW_TILE - _MAX_ROW_TILE % 8, 7, -8):
        if num_rows % tr == 0:
            return tr
    for tr in range(_MAX_ROW_TILE, 0, -1):
        if num_rows % tr == 0:
            return tr
    return num_rows


def positional_encoding_forward(x, pe, *, p, train, seed=0):
    """x: (B, S, D).  Returns dropout(x + pe[:, :S, :]) (inverted dropout)."""
    B, S, D = x.shape
    row = S * D

    # Lane-dense view: fold the flattened (S*D) row onto 128 lanes when possible.
    C = 128 if row % 128 == 0 else row       # odd/tiny shapes: single full-row block
    R = row // C
    TR = _choose_row_tile(R)
    n_row_tiles = pl.cdiv(R, TR)             # == R // TR by construction

    x_flat = x.reshape(B, R, C)              # free row-major reshape
    # One-time window on the registered buffer; a no-op when S == seq_length.
    pe_used = pe if pe.shape[1] == S else pe[:, :S, :]
    pe_flat = pe_used.reshape(1, R, C)

    seed_arr = jnp.array([seed], dtype=jnp.int32)
    kernel = partial(_pe_add_dropout_kernel, p=float(p), train=bool(train))

    # 3 arrays x 2 pipeline buffers x tile + headroom; safe on v5e/v6e/v7x.
    tile_bytes = TR * C * 4
    vmem_limit = int(min(64 * 1024 * 1024, max(16 * 1024 * 1024, 8 * tile_bytes)))

    out_flat = pl.pallas_call(
        kernel,
        out_shape=jax.ShapeDtypeStruct((B, R, C), x.dtype),
        grid_spec=pltpu.PrefetchScalarGridSpec(
            num_scalar_prefetch=1,                                   # seed -> SMEM
            grid=(B, n_row_tiles),
            in_specs=[
                pl.BlockSpec((1, TR, C), lambda b, t, seed: (b, t, 0)),  # x tile
                pl.BlockSpec((1, TR, C), lambda b, t, seed: (0, t, 0)),  # pe (bcast over B)
            ],
            out_specs=pl.BlockSpec((1, TR, C), lambda b, t, seed: (b, t, 0)),
        ),
        compiler_params=pltpu.CompilerParams(
            dimension_semantics=("parallel", "parallel"),   # 2-TC sharding on v7x
            vmem_limit_bytes=vmem_limit,
        ),
    )(seed_arr, x_flat, pe_flat)
    return out_flat.reshape(B, S, D)


if __name__ == "__main__":
    # d_model is forced to 2 by the reference's `pe[:, 0::1]` assignment.
    B, S, D = 2, 8, 2
    dropout_p = 0.1

    k0, k1 = jax.random.split(jax.random.PRNGKey(0))
    x = jax.random.normal(k0, (B, S, D), dtype=jnp.float32)
    pe = make_pe_buffer(d_model=D, seq_length=S)

    # Eval mode (dropout = identity): must match the plain-JAX reference.
    y_eval = positional_encoding_forward(x, pe, p=dropout_p, train=False)
    jax.block_until_ready(y_eval)
    ref = x + pe[:, :S, :]
    assert jnp.allclose(y_eval, ref, atol=1e-6), "mismatch vs reference (eval mode)"

    # Train mode: in-kernel inverted dropout (integer-threshold keyed hash).
    # TODO(synk): dropout mask is statistically equivalent to torch's, not
    # bit-identical, and depends on the chosen tiling for a given seed.
    y_train = positional_encoding_forward(x, pe, p=dropout_p, train=True, seed=123)
    jax.block_until_ready(y_train)
    assert y_train.shape == x.shape and y_train.dtype == x.dtype
    kept = y_train != 0.0
    assert jnp.allclose(jnp.where(kept, y_train, 0.0),
                        jnp.where(kept, ref / (1.0 - dropout_p), 0.0),
                        atol=1e-5), "kept elements must equal (x + pe) / (1 - p)"

    # Larger sequence exercising the lane-dense (C = 128) tiled path.
    S2 = 512
    x2 = jax.random.normal(k1, (B, S2, D), dtype=jnp.float32)
    pe2 = make_pe_buffer(d_model=D, seq_length=S2)
    y2 = positional_encoding_forward(x2, pe2, p=dropout_p, train=False)
    jax.block_until_ready(y2)
    ref2 = x2 + pe2[:, :S2, :]
    assert jnp.allclose(y2, ref2, atol=1e-6), "mismatch vs reference (lane-dense path)"

    print("KERNEL_OK")
</pallas_src>

<mosaic_0001>
module attributes {stable_mosaic.version = 11 : i64} {
  func.func @_pe_add_dropout_kernel(%arg0: i32, %arg1: i32, %arg2: memref<1xi32, #tpu.memory_space<smem>>, %arg3: memref<1x1x16xf32, #tpu.memory_space<vmem>>, %arg4: memref<1x1x16xf32, #tpu.memory_space<vmem>>, %arg5: memref<1x1x16xf32, #tpu.memory_space<vmem>>) attributes {dimension_semantics = [#tpu.dimension_semantics<parallel>, #tpu.dimension_semantics<parallel>], iteration_bounds = array<i64: 2, 1>, scalar_prefetch = 1 : i64, scratch_operands = 0 : i64, tpu.core_type = #tpu.core_type<tc>, window_params = [{transform_indices = @transform_0, window_bounds = array<i64: 1, 1, 16>}, {transform_indices = @transform_1, window_bounds = array<i64: 1, 1, 16>}, {transform_indices = @transform_2, window_bounds = array<i64: 1, 1, 16>}]} {
    %c0 = arith.constant 0 : index
    %c0_0 = arith.constant 0 : index
    %c0_1 = arith.constant 0 : index
    %0 = vector.load %arg3[%c0, %c0_0, %c0_1] : memref<1x1x16xf32, #tpu.memory_space<vmem>>, vector<1x1x16xf32>
    %c0_2 = arith.constant 0 : index
    %c0_3 = arith.constant 0 : index
    %c0_4 = arith.constant 0 : index
    %1 = vector.load %arg4[%c0_2, %c0_3, %c0_4] : memref<1x1x16xf32, #tpu.memory_space<vmem>>, vector<1x1x16xf32>
    %2 = arith.addf %0, %1 : vector<1x1x16xf32>
    %c0_5 = arith.constant 0 : index
    %c0_6 = arith.constant 0 : index
    %c0_7 = arith.constant 0 : index
    %3 = vector.load %arg5[%c0_5, %c0_6, %c0_7] : memref<1x1x16xf32, #tpu.memory_space<vmem>>, vector<1x1x16xf32>
    tpu.vector_store %arg5[%c0_5, %c0_6, %c0_7], %2 {strides = array<i32>} : memref<1x1x16xf32, #tpu.memory_space<vmem>>, vector<1x1x16xf32>,
    return
  }
  func.func @transform_0(%arg0: i32, %arg1: i32, %arg2: memref<1xi32, #tpu.memory_space<smem>>) -> (i32, i32, i32) {
    %c0_i32 = arith.constant 0 : i32
    %c0_i32_0 = arith.constant 0 : i32
    return %arg0, %arg1, %c0_i32 : i32, i32, i32
  }
  func.func @transform_1(%arg0: i32, %arg1: i32, %arg2: memref<1xi32, #tpu.memory_space<smem>>) -> (i32, i32, i32) {
    %c0_i32 = arith.constant 0 : i32
    %c0_i32_0 = arith.constant 0 : i32
    %c0_i32_1 = arith.constant 0 : i32
    return %c0_i32, %arg1, %c0_i32_0 : i32, i32, i32
  }
  func.func @transform_2(%arg0: i32, %arg1: i32, %arg2: memref<1xi32, #tpu.memory_space<smem>>) -> (i32, i32, i32) {
    %c0_i32 = arith.constant 0 : i32
    %c0_i32_0 = arith.constant 0 : i32
    return %arg0, %arg1, %c0_i32 : i32, i32, i32
  }
}

</mosaic_0001>

<bundles_post_ra>
// kernel: tpu_custom_call.1
= control target key start
LH: loop header
LB: loop body
LE: loop exit
PB: predicated region body
PF: predicated region fallthrough
CT: control target
= control target key end

     0   :  { %9 = vsyncpa [#allocation5], 0  ;;  %s589_s0 = inlined_call_operand.<no memory space> [shape: s32[1], index: 0, kind: input, shape index: {}]   ;;  %s590_s1 = inlined_call_operand.vmem [shape: f32[2,1,16], index: 1, kind: input, shape index: {}]   ;;  %s591_s2 = inlined_call_operand.hbm [shape: f32[1,1,16], index: 2, kind: input, shape index: {}]   ;;  %s592_s3 = inlined_call_operand.hbm [shape: f32[2,1,16], index: 3, kind: output, shape index: {}]  }
   0x1   :  { %10 = vsyncpa [#allocation6], 0 }
   0x2   :  { %12 = vsyncpa [#allocation6 + $0x1], 0  ;;  %s489_s12 = smov 0   ;;  %s491_s13 = smov 0  }
   0x3   :  { %s493_s14 = smov 0   ;;  %s495_s15 = smov 0  }
   0x4   :  { %s497_s0 = smov 0   ;;  %s499_s16 = smov 0  }
   0x5 LB: > { %s279_s17 = sadd.s32 4294967295, %s466_s16   ;;  %s280_s18 = sadd.s32 4294967294, %s466_s16   ;;  %s466_s16 = sphi %s499_s16, %s18_s16   ;;  %s462_s0 = sphi %s497_s0, %s599_s0   ;;  %s458_s15 = sphi %s495_s15, %s598_s15   ;;  %s454_s14 = sphi %s493_s14, %s597_s14   ;;  %s450_s13 = sphi %s491_s13, %s596_s13   ;;  %s446_s12 = sphi %s489_s12, %s595_s12  }
   0x6   : > { %s30_s19 = sadd.s32 1, %s462_s0  ;;  %s93_s20 = sadd.s32 1, %s454_s14 }
   0x7   : > { %p32_p0 = scmp.ge.s32.totalorder %s30_s19, 2  ;;  %p103_p1 = scmp.ne.s32.totalorder %s454_s14, %s450_s13 }
   0x8   : > { %p104_p2 = scmp.eq.s32.totalorder %s279_s17, 1  ;;  %p109_p3 = scmp.ne.s32.totalorder %s450_s13, %s446_s12 }
   0x9   : > { %s601_s19 = smov (%p32_p0, %s30_s19), 0  ;;  %p110_p5 = scmp.eq.s32.totalorder %s280_s18, 1 }
   0xa   : > { %p529_p4 = por %p104_p2, %p103_p1  ;;  %s88_s22 = ssub.s32 %s462_s0, %s601_s19 }
   0xb   : > { %p281_p6 = scmp.ge.s32.totalorder %s466_s16, 1  ;;  %p91_p7 = scmp.eq.s32.totalorder %s88_s22, 0 }
   0xc   : > { %p536_p8 = por %p110_p5, %p109_p3  ;;  %p117_p9 = scmp.lt.s32.totalorder %s466_s16, 3 }
   0xd   : > { %s542_s24 = scalar_select %p91_p7, %s454_s14, %s93_s20  }
   0xe   : > { %p118_p10 = pnand %p281_p6, %p117_p9  ;;  %p302_p11 = scmp.eq.s32.totalorder %s279_s17, 0 }
   0xf   : > { %s130_s27 = sshll.u32 %s591_s2, 4  ;;  %s468_s28 = smov [#allocation4]   ;;  %s131_s27 = int_to_ptr.hbm [resolvable:$true] %s130_s27 }
  0x10   : > { %p294_p12 = pneg %p118_p10  ;;  %s132_s29 = sshll.u32 %s468_s28, 4  ;;  %s133_s29 = int_to_ptr.vmem [resolvable:$true] %s132_s29 }
  0x11   : > { %154 = sbr.rel (%p118_p10) target bundleno = 40 (0x28), region = 28 }
  0x12   : > { %p295_p13 = pnand %p302_p11, %p294_p12 }
  0x14   : > { %297 = dma.hbm_to_vmem [thread:$0]  (!%p295_p13), %s131_s27, 16, %s133_s29, [#allocation5]  }
  0x16   : > { %437 = dma.done.wait (%p302_p11), [#allocation5], 16  }
  0x17   : > { %439 = vsyncadd (%p302_p11), [#allocation5], 4294967280  ;;  %s175_s30 = sand.u32 1, %s450_s13   ;;  %p177_p0 = scmp.lt.s32.totalorder %s458_s15, 1  ;;  %v184_v1 = vld [vmem:[#allocation4] sm:$0x1] }
  0x18   : > { %s198_s7 = scalar_lea.hbm %s592_s3, %s458_s15  ;;  %s176_s11 = scalar_lea.vmem [#allocation7], %s175_s30  ;;  %vm186_vm0 = vcmask 122880  }
  0x19   : > { %s178_s4 = scalar_select %p177_p0, %s458_s15, 1 }
  0x1a   : > { %s200_s17 = sshll.u32 %s176_s11, 4  ;;  %s202_s18 = sshll.u32 %s198_s7, 4  ;;  %s201_s17 = int_to_ptr.vmem [resolvable:$true] %s200_s17  ;;  %s203_s18 = int_to_ptr.hbm [resolvable:$true] %s202_s18 }
  0x1b   : > { %s182_s10 = scalar_lea.vmem %s590_s1, %s178_s4  ;;  %s189_s20 = scalar_lea.sflag [#allocation6], %s175_s30 }
  0x1c   : > { %v183_v0 = vld [vmem:[%s182_s10] sm:$0x1]  ;;  %s398_s22 = sshra.s32 %s203_s18, 4  ;;  %s404_s27 = scalar_lea.hbm %s592_s3, 2  ;;  %s399_s22 = int_to_ptr.hbm [resolvable:$true] %s398_s22 }
  0x1d   : > { %v185_v2 = vadd.f32 %v184_v1, %v183_v0  ;;  %s400_s25 = scalar_lea.hbm %s399_s22, 1  ;;  %p405_p5 = scmp.lt.s32.totalorder %s399_s22, %s592_s3 }
  0x1e   : > { %p401_p1 = scmp.ne.s32.totalorder %s399_s22, %s400_s25  ;;  %p406_p6 = scmp.lt.s32.totalorder %s404_s27, %s400_s25 }
  0x1f   : > { %187 = vst.msk [vmem:[%s176_s11] sm:$0x1] %vm186_vm0, %v185_v2 }
  0x20   : > { %p402_p2 = pnand %p401_p1, %p529_p4  ;;  %p407_p7 = por %p406_p6, %p405_p5 }
  0x22   : > { %p403_p3 = pneg %p402_p2 }
  0x24   : > { %p408_p9 = pnand %p407_p7, %p403_p3 }
  0x26   : > { %411 = shalt.err (!%p408_p9)
}
  0x27   : > { %292 = dma.vmem_to_hbm [thread:$0]  (%p529_p4), %s201_s17, 16, %s203_s18, %s189_s20  }
  0x28 PF: > { %p304_p10 = scmp.ge.s32.totalorder %s466_s16, 2  ;;  %s214_s30 = sand.u32 1, %s446_s12  }
  0x29   : > { %s215_s4 = scalar_lea.sflag [#allocation6], %s214_s30 }
  0x2a   : > { %p299_p11 = pnand %p304_p10, %p536_p8 }
  0x2c   : > { %p300_p12 = pneg %p299_p11 }
  0x2e   : > { %441 = dma.done.wait (%p300_p12), %s215_s4, 16  }
  0x2f   : > { %443 = vsyncadd (%p300_p12), %s215_s4, 4294967280  ;;  %s18_s16 = sadd.s32 1, %s466_s16   ;;  %s595_s12 = smov %s450_s13 }
  0x30   : > { %p15_p13 = scmp.ge.s32.totalorder %s18_s16, 4   ;;  %s596_s13 = smov %s454_s14 }
  0x31   : > { %s597_s14 = smov %s542_s24  ;;  %s598_s15 = smov %s462_s0 }
  0x32   : > { %s599_s0 = smov %s601_s19  ;;  %17 = sbr.rel (!%p15_p13) target bundleno = 5 (0x5), region = 69 }
  0x37   :  { %220 = vsyncpa [#allocation5], 1 }
  0x38   :  { %222 = vsyncpa [#allocation5 + $0x1], 1 }
  0x39   :  { %223 = vsyncpa [#allocation6], 1 }
  0x3a   :  { %225 = vsyncpa [#allocation6 + $0x1], 1 }

</bundles_post_ra>
